<compile_context>
chip_gen: v5e
topology: v5e:2x2
jax: 0.10.0
libtpu: 0.0.40
codegen_flags: <defaults>
</compile_context>

<pallas_src>
import jax
import jax.numpy as jnp
from jax.experimental import pallas as pl
from jax.experimental.pallas import tpu as pltpu

_HPAD = 128                     # hidden / output feature dims padded to one lane width
_MAX_TB = 1024                  # hard cap on batch rows per grid step
_TILE_BYTES_BUDGET = 4 << 20    # soft per-operand tile budget (keeps VMEM tiny)


def _mlp_kernel(x_ref, w1t_ref, w2t_ref, b2_ref, o_ref):
    # x: (TB, F), w1t: (F, 128), w2t: (128, 128), b2: (1, 128), o: (TB, 128)
    x = x_ref[...]
    # Linear1 (no bias) + ReLU -> hidden (TB, 128); padded lanes stay exactly 0.
    h = jnp.maximum(
        jnp.dot(x, w1t_ref[...], preferred_element_type=jnp.float32), 0.0
    )
    # Linear2 (with bias) -> (TB, 128); padded weight rows/cols are 0, padded
    # bias lanes are 0, so the padded output columns are 0.
    out = jnp.dot(h, w2t_ref[...], preferred_element_type=jnp.float32) + b2_ref[...]
    o_ref[...] = out.astype(o_ref.dtype)


def _round_up(n, m):
    return ((n + m - 1) // m) * m


def non_linear_sk_forward(x, w1, w2, b2):
    """x: (B, F) f32; w1: (10, F); w2: (10, 10); b2: (10,).  Returns (B, 10)."""
    B, F = x.shape
    H = w1.shape[0]          # 10
    assert w1.shape == (H, F) and w2.shape == (H, H) and b2.shape == (H,)

    # --- layout plumbing in the wrapper (done once by XLA, outside kernel) ---
    # Pre-transpose + zero-pad weights / bias to lane-dense 128-wide tiles.
    w1t = jnp.zeros((F, _HPAD), jnp.float32).at[:, :H].set(w1.T.astype(jnp.float32))
    w2t = jnp.zeros((_HPAD, _HPAD), jnp.float32).at[:H, :H].set(w2.T.astype(jnp.float32))
    b2p = jnp.zeros((1, _HPAD), jnp.float32).at[0, :H].set(b2.astype(jnp.float32))

    # Batch tiling: small batches -> single tile (rounded to a sublane multiple),
    # large batches -> stream in TB-row tiles across the grid.  TB is sized so
    # both the input tile (TB x F) and the output tile (TB x 128) stay within a
    # small VMEM budget even with double-buffering.
    bytes_per_row = 4 * max(F, _HPAD)
    tb_cap = max(8, (_TILE_BYTES_BUDGET // bytes_per_row) // 8 * 8)
    TB = min(_MAX_TB, tb_cap, _round_up(B, 8))
    B_pad = _round_up(B, TB)

    x_p = x.astype(jnp.float32)
    if B_pad != B:
        x_p = jnp.pad(x_p, ((0, B_pad - B), (0, 0)))

    grid = (pl.cdiv(B_pad, TB),)

    out_padded = pl.pallas_call(
        _mlp_kernel,
        out_shape=jax.ShapeDtypeStruct((B_pad, _HPAD), jnp.float32),
        grid=grid,
        in_specs=[
            pl.BlockSpec((TB, F), lambda i: (i, 0)),         # x: streamed over batch
            pl.BlockSpec((F, _HPAD), lambda i: (0, 0)),      # w1t: resident in VMEM
            pl.BlockSpec((_HPAD, _HPAD), lambda i: (0, 0)),  # w2t: resident in VMEM
            pl.BlockSpec((1, _HPAD), lambda i: (0, 0)),      # bias: resident in VMEM
        ],
        out_specs=pl.BlockSpec((TB, _HPAD), lambda i: (i, 0)),
        compiler_params=pltpu.CompilerParams(
            dimension_semantics=("parallel",),   # shard batch tiles across TCs
            vmem_limit_bytes=32 * 1024 * 1024,   # safe on v5e/v6e/v7x
        ),
    )(x_p, w1t, w2t, b2p)

    # Slice away batch padding and the zero-padded output lanes.
    return out_padded[:B, :H]


if __name__ == "__main__":
    # Small shapes consistent with the module: dim_emb=16 (unused by forward),
    # feat_size=32, batch=8.
    feat_size = 32
    batch = 8

    key = jax.random.PRNGKey(0)
    kx, k1, k2, kb = jax.random.split(key, 4)

    # Deterministic parameter init (uniform, roughly PyTorch's default scale).
    bound1 = 1.0 / (feat_size ** 0.5)
    bound2 = 1.0 / (10 ** 0.5)
    w1 = jax.random.uniform(k1, (10, feat_size), jnp.float32, -bound1, bound1)
    w2 = jax.random.uniform(k2, (10, 10), jnp.float32, -bound2, bound2)
    b2 = jax.random.uniform(kb, (10,), jnp.float32, -bound2, bound2)

    x = jax.random.normal(kx, (batch, feat_size), jnp.float32)

    out = non_linear_sk_forward(x, w1, w2, b2)
    out = jax.block_until_ready(out)

    # Reference check in plain JAX (same math as the PyTorch forward).
    ref = jnp.maximum(x @ w1.T, 0.0) @ w2.T + b2
    assert out.shape == (batch, 10)
    assert jnp.allclose(out, ref, atol=1e-5, rtol=1e-5)

    print("KERNEL_OK")
</pallas_src>

<mosaic_0001>
module attributes {stable_mosaic.version = 11 : i64} {
  func.func @_mlp_kernel(%arg0: i32, %arg1: memref<8x32xf32, #tpu.memory_space<vmem>>, %arg2: memref<32x128xf32, #tpu.memory_space<vmem>>, %arg3: memref<128x128xf32, #tpu.memory_space<vmem>>, %arg4: memref<1x128xf32, #tpu.memory_space<vmem>>, %arg5: memref<8x128xf32, #tpu.memory_space<vmem>>) attributes {dimension_semantics = [#tpu.dimension_semantics<parallel>], iteration_bounds = array<i64: 1>, scalar_prefetch = 0 : i64, scratch_operands = 0 : i64, tpu.core_type = #tpu.core_type<tc>, window_params = [{transform_indices = @transform_0, window_bounds = array<i64: 8, 32>}, {pipeline_mode = #tpu.pipeline_mode<synchronous>, transform_indices = @transform_1, window_bounds = array<i64: 32, 128>}, {pipeline_mode = #tpu.pipeline_mode<synchronous>, transform_indices = @transform_2, window_bounds = array<i64: 128, 128>}, {pipeline_mode = #tpu.pipeline_mode<synchronous>, transform_indices = @transform_3, window_bounds = array<i64: 1, 128>}, {transform_indices = @transform_4, window_bounds = array<i64: 8, 128>}]} {
    %c0 = arith.constant 0 : index
    %c0_0 = arith.constant 0 : index
    %0 = vector.load %arg1[%c0, %c0_0] : memref<8x32xf32, #tpu.memory_space<vmem>>, vector<8x32xf32>
    %c0_1 = arith.constant 0 : index
    %c0_2 = arith.constant 0 : index
    %1 = vector.load %arg2[%c0_1, %c0_2] : memref<32x128xf32, #tpu.memory_space<vmem>>, vector<32x128xf32>
    %cst = arith.constant dense<0.000000e+00> : vector<8x128xf32>
    %2 = tpu.matmul %0, %1, %cst {dimension_numbers = #tpu.dot_dimension_numbers<[1], [0], [0], [1], [0, 0, 1, 1], [], []>} : vector<8x32xf32>, vector<32x128xf32>, vector<8x128xf32> -> vector<8x128xf32>
    %cst_3 = arith.constant 0.000000e+00 : f32
    %3 = vector.broadcast %cst_3 : f32 to vector<8x128xf32>
    %4 = arith.maximumf %2, %3 : vector<8x128xf32>
    %c0_4 = arith.constant 0 : index
    %c0_5 = arith.constant 0 : index
    %5 = vector.load %arg3[%c0_4, %c0_5] : memref<128x128xf32, #tpu.memory_space<vmem>>, vector<128x128xf32>
    %cst_6 = arith.constant dense<0.000000e+00> : vector<8x128xf32>
    %6 = tpu.matmul %4, %5, %cst_6 {dimension_numbers = #tpu.dot_dimension_numbers<[1], [0], [0], [1], [0, 0, 1, 1], [], []>} : vector<8x128xf32>, vector<128x128xf32>, vector<8x128xf32> -> vector<8x128xf32>
    %c0_7 = arith.constant 0 : index
    %c0_8 = arith.constant 0 : index
    %7 = vector.load %arg4[%c0_7, %c0_8] : memref<1x128xf32, #tpu.memory_space<vmem>>, vector<1x128xf32>
    %8 = vector.broadcast %7 : vector<1x128xf32> to vector<8x128xf32>
    %9 = arith.addf %6, %8 : vector<8x128xf32>
    %c0_9 = arith.constant 0 : index
    %c0_10 = arith.constant 0 : index
    %10 = vector.load %arg5[%c0_9, %c0_10] : memref<8x128xf32, #tpu.memory_space<vmem>>, vector<8x128xf32>
    tpu.vector_store %arg5[%c0_9, %c0_10], %9 {strides = array<i32>} : memref<8x128xf32, #tpu.memory_space<vmem>>, vector<8x128xf32>,
    return
  }
  func.func @transform_0(%arg0: i32) -> (i32, i32) {
    %c0_i32 = arith.constant 0 : i32
    %c0_i32_0 = arith.constant 0 : i32
    return %arg0, %c0_i32 : i32, i32
  }
  func.func @transform_1(%arg0: i32) -> (i32, i32) {
    %c0_i32 = arith.constant 0 : i32
    %c0_i32_0 = arith.constant 0 : i32
    %c0_i32_1 = arith.constant 0 : i32
    return %c0_i32, %c0_i32_0 : i32, i32
  }
  func.func @transform_2(%arg0: i32) -> (i32, i32) {
    %c0_i32 = arith.constant 0 : i32
    %c0_i32_0 = arith.constant 0 : i32
    %c0_i32_1 = arith.constant 0 : i32
    return %c0_i32, %c0_i32_0 : i32, i32
  }
  func.func @transform_3(%arg0: i32) -> (i32, i32) {
    %c0_i32 = arith.constant 0 : i32
    %c0_i32_0 = arith.constant 0 : i32
    %c0_i32_1 = arith.constant 0 : i32
    return %c0_i32, %c0_i32_0 : i32, i32
  }
  func.func @transform_4(%arg0: i32) -> (i32, i32) {
    %c0_i32 = arith.constant 0 : i32
    %c0_i32_0 = arith.constant 0 : i32
    return %arg0, %c0_i32 : i32, i32
  }
}

</mosaic_0001>

<bundles_post_ra>
// kernel: tpu_custom_call.1
= control target key start
LH: loop header
LB: loop body
LE: loop exit
PB: predicated region body
PF: predicated region fallthrough
CT: control target
= control target key end

     0   :  { %9 = vsyncpa [#allocation3], 0  ;;  %s308_s0 = inlined_call_operand.hbm [shape: f32[8,32], index: 0, kind: input, shape index: {}]   ;;  %s309_s1 = inlined_call_operand.hbm [shape: f32[32,128], index: 1, kind: input, shape index: {}]   ;;  %s310_s2 = inlined_call_operand.hbm [shape: f32[128,128], index: 2, kind: input, shape index: {}]   ;;  %s311_s3 = inlined_call_operand.vmem [shape: f32[1,128], index: 3, kind: input, shape index: {}]   ;;  %s312_s4 = inlined_call_operand.hbm [shape: f32[8,128], index: 4, kind: output, shape index: {}]  }
   0x1   :  { %10 = vsyncpa [#allocation6], 0  ;;  %s27_s17 = sshll.u32 %s309_s1, 4  ;;  %s28_s17 = int_to_ptr.hbm [resolvable:$true] %s27_s17 }
   0x2   :  { %11 = vsyncpa [#allocation4], 0  ;;  %s262_s18 = smov [#allocation5]   ;;  %s17_s22 = sshll.u32 %s308_s0, 4  ;;  %s18_s22 = int_to_ptr.hbm [resolvable:$true] %s17_s22 }
   0x3   :  { %s29_s19 = sshll.u32 %s262_s18, 4  ;;  %s263_s23 = smov 128   ;;  %s30_s19 = int_to_ptr.vmem [resolvable:$true] %s29_s19 }
   0x4   :  { %s264_s24 = smov 8   ;;  %s265_s25 = smov [#allocation2]  }
   0x5   :  { %35 = dma.hbm_to_vmem [thread:$0]  %s28_s17, 512, %s30_s19, [#allocation6], %s263_s23, %s263_s23, %s264_s24  }
   0x6   :  { %s19_s26 = sshll.u32 %s265_s25, 4  ;;  %s40_s29 = sshll.u32 %s310_s2, 4  ;;  %s20_s26 = int_to_ptr.vmem [resolvable:$true] %s19_s26  ;;  %s41_s29 = int_to_ptr.hbm [resolvable:$true] %s40_s29 }
   0x7   :  { %22 = dma.hbm_to_vmem [thread:$0]  %s18_s22, 128, %s20_s26, [#allocation3]  }
   0x8   :  { %s266_s1 = smov [#allocation7]  }
   0x9   :  { %s42_s30 = sshll.u32 %s266_s1, 4  ;;  %s43_s30 = int_to_ptr.vmem [resolvable:$true] %s42_s30 }
   0xa   :  { %48 = dma.hbm_to_vmem [thread:$0]  %s41_s29, 2048, %s43_s30, [#allocation6], %s263_s23, %s263_s23, %s264_s24  }
   0xb   :  { %256 = dma.done.wait [#allocation3], 128  }
   0xc   :  { %257 = vsyncadd [#allocation3], 4294967168 }
   0xd   :  { %258 = dma.done.wait [#allocation6], 2560  }
   0xe   :  { %259 = vsyncadd [#allocation6], 4294964736  ;;  %v67_v0 = vld [vmem:[#allocation5 + $0x18] sm:$0xff]  ;;  %v66_v1 = vld [vmem:[#allocation5 + $0x10] sm:$0xff]  ;;  %vm68_vm0 = vcmask 261120   ;;  %s267_s5 = smov [#allocation8]  }
   0xf   :  { %84 = vmatpush.msra.mxu0 %v67_v0  ;;  %v108_v2 = vld [vmem:[#allocation7 + $0x78] sm:$0xff]  ;;  %v65_v3 = vld [vmem:[#allocation5 + $0x8] sm:$0xff]  ;;  %v107_v4 = vld [vmem:[#allocation7 + $0x70] sm:$0xff]  ;;  %s139_s6 = sshll.u32 %s267_s5, 4  ;;  %s141_s9 = sshll.u32 %s312_s4, 4  ;;  %s140_s6 = int_to_ptr.vmem [resolvable:$true] %s139_s6  ;;  %s142_s9 = int_to_ptr.hbm [resolvable:$true] %s141_s9 }
  0x10   :  { %113 = vmatpush.msra.mxu1 %v108_v2  ;;  %v106_v5 = vld [vmem:[#allocation7 + $0x68] sm:$0xff]  ;;  %v64_v6 = vld [vmem:[#allocation5] sm:$0xff]  ;;  %v63_v7 = vld [vmem:[#allocation2] sm:$0xff] }
  0x11   :  { %85 = vmatpush.msra.mxu0 %v66_v1  ;;  %v105_v8 = vld [vmem:[#allocation7 + $0x60] sm:$0xff]  ;;  %v104_v9 = vld [vmem:[#allocation7 + $0x58] sm:$0xff]  ;;  %v103_v10 = vld [vmem:[#allocation7 + $0x50] sm:$0xff] }
  0x12   :  { %114 = vmatpush.msra.mxu1 %v107_v4  ;;  %v102_v11 = vld [vmem:[#allocation7 + $0x48] sm:$0xff]  ;;  %v101_v12 = vld [vmem:[#allocation7 + $0x40] sm:$0xff]  ;;  %v100_v13 = vld [vmem:[#allocation7 + $0x38] sm:$0xff] }
  0x13   :  { %86 = vmatpush.msra.mxu0 %v65_v3  ;;  %v99_v14 = vld [vmem:[#allocation7 + $0x30] sm:$0xff]  ;;  %v98_v15 = vld [vmem:[#allocation7 + $0x28] sm:$0xff]  ;;  %v97_v16 = vld [vmem:[#allocation7 + $0x20] sm:$0xff] }
  0x14   :  { %115 = vmatpush.msra.mxu1 %v106_v5  ;;  %v96_v17 = vld [vmem:[#allocation7 + $0x18] sm:$0xff]  ;;  %v95_v18 = vld [vmem:[#allocation7 + $0x10] sm:$0xff]  ;;  %v94_v19 = vld [vmem:[#allocation7 + $0x8] sm:$0xff] }
  0x15   :  { %87 = vmatpush.msra.mxu0 %v64_v6  ;;  %v93_v20 = vld [vmem:[#allocation7] sm:$0xff]  ;;  %v159_v23 = vld [vmem:[%s311_s3] ss:$0 sm:$0xff] }
  0x16   :  { %152 = vmatmul.msk.f32.vlgmr.msra.gmra.mxu0 %vm68_vm0, %v63_v7  ;;  %116 = vmatpush.msra.mxu1 %v105_v8 }
  0x18   :  { %117 = vmatpush.msra.mxu1 %v104_v9 }
  0x1a   :  { %118 = vmatpush.msra.mxu1 %v103_v10 }
  0x1c   :  { %119 = vmatpush.msra.mxu1 %v102_v11 }
  0x1e   :  { %120 = vmatpush.msra.mxu1 %v101_v12 }
  0x20   :  { %121 = vmatpush.msra.mxu1 %v100_v13 }
  0x22   :  { %122 = vmatpush.msra.mxu1 %v99_v14 }
  0x24   :  { %123 = vmatpush.msra.mxu1 %v98_v15 }
  0x26   :  { %124 = vmatpush.msra.mxu1 %v97_v16 }
  0x28   :  { %125 = vmatpush.msra.mxu1 %v96_v17 }
  0x2a   :  { %126 = vmatpush.msra.mxu1 %v95_v18 }
  0x2c   :  { %127 = vmatpush.msra.mxu1 %v94_v19 }
  0x2e   :  { %128 = vmatpush.msra.mxu1 %v93_v20 }
  0x93   :  { %v89_v21 = vpop.f32.mrf.mxu0 }
  0x94   :  { %v92_v22 = vmax.f32 %v89_v21, 0.0 }
  0x96   :  { %129 = vmatmul.f32.vlgmr.msra.gmra.mxu1 %v92_v22 }
 0x113   :  { %v130_v24 = vpop.f32.mrf.mxu1 }
 0x114   :  { %v131_v25 = vadd.f32 %v159_v23, %v130_v24 }
 0x116   :  { %133 = vst [vmem:[#allocation8] sm:$0xff] %v131_v25 }
 0x117   :  { %144 = dma.vmem_to_hbm [thread:$0]  %s140_s6, 128, %s142_s9, [#allocation4]  }
 0x118   :  { %260 = dma.done.wait [#allocation4], 128  }
 0x119   :  { %261 = vsyncadd [#allocation4], 4294967168 }
 0x11a   :  { %149 = vsyncpa [#allocation3], 1 }
 0x11b   :  { %150 = vsyncpa [#allocation6], 1 }
 0x11c   :  { %151 = vsyncpa [#allocation4], 1 }

</bundles_post_ra>
